<compile_context>
chip_gen: v7x
topology: tpu7x:2x2x1
jax: 0.10.0
libtpu: 0.0.40
codegen_flags: <defaults>
</compile_context>

<pallas_src>
import functools
import math

import jax
import jax.numpy as jnp
from jax.experimental import pallas as pl
from jax.experimental.pallas import tpu as pltpu

PACK = 8  # batch rows packed per lane-dense output row (= f32 sublane count)
_HIGHEST = jax.lax.Precision.HIGHEST


# --------------------------------------------------------------------------
# Kernel: one lane-dense (tbp, PACK*D) x (PACK*D, PACK*A) matmul + bias.
# --------------------------------------------------------------------------
def _qsl_kernel(x_ref, w_ref, b_ref, out_ref):
    out_ref[...] = (
        jnp.dot(x_ref[...], w_ref[...], preferred_element_type=jnp.float32)
        + b_ref[...]
    ).astype(out_ref.dtype)


def _round_up(x, m):
    return (x + m - 1) // m * m


def quantum_strategy_layer(market_data, params, symbol_ids=None, *, block_b=8192):
    """market_data: (B, S, D) float32.  Returns final_output: (B, A).

    symbol_ids is accepted for API parity with the PyTorch module but unused
    (the reference forward never reads it).
    """
    del symbol_ids  # unused by the reference forward
    B, S, D = market_data.shape
    A = params["wfc"].shape[1]

    # --- fold the affine chain into one (D, A) weight + (1, A) bias ---------
    #   out = ((((x @ Ws + bs) @ Wv + bv) @ Wiv + biv) @ Wo + bo) @ Wfc + bfc
    # Folded at HIGHEST precision: the fold is tiny and off the hot path, and
    # default-precision chaining would compound bf16 rounding multiplicatively.
    dot = functools.partial(jnp.dot, precision=_HIGHEST)
    w_fold = dot(dot(dot(dot(params["ws"], params["wv"]), params["wiv"]),
                     params["wo"]), params["wfc"])                       # (D, A)
    b_fold = dot(dot(dot(dot(params["bs"], params["wv"]) + params["bv"],
                         params["wiv"]) + params["biv"],
                     params["wo"]) + params["bo"],
                 params["wfc"]) + params["bfc"]                           # (1, A)

    # --- lane-dense packing: 8 batch rows per vreg row -----------------------
    # Block-diagonal weight (PACK*D, PACK*A) and tiled bias (1, PACK*A):
    #   (x packed row r) @ w_block == concat_j (x_last[8r+j] @ w_fold)
    w_block = jnp.kron(jnp.eye(PACK, dtype=w_fold.dtype), w_fold)  # (PACK*D, PACK*A)
    b_block = jnp.tile(b_fold, (1, PACK))                          # (1, PACK*A)

    # --- batch tiling (in packed rows), balanced across >= 2 blocks ---------
    bp_needed = pl.cdiv(B, PACK)                        # packed rows required
    max_tbp = max(8, _round_up(block_b, PACK) // PACK)  # tile cap (packed rows)
    n_blocks = pl.cdiv(bp_needed, max_tbp)
    if bp_needed >= 16:                                 # enough work: let v7x's
        n_blocks = max(n_blocks, 2)                     # two TCs split it evenly
    tbp = _round_up(pl.cdiv(bp_needed, n_blocks), 8)    # sublane-aligned tile
    n_blocks = pl.cdiv(bp_needed, tbp)
    bp = n_blocks * tbp
    b_padded = bp * PACK

    # Last-step slice + minimal zero-pad + packing reshape.  Under jit these
    # fuse into a single copy; the reshapes are zero-copy row-major views.
    x_last = market_data[:, S - 1, :]                   # (B, D)
    if b_padded != B:
        x_last = jnp.pad(x_last, ((0, b_padded - B), (0, 0)))
    x_packed = x_last.reshape(bp, PACK * D)             # (bp, PACK*D)

    # Per-tile compute is one small matmul; expose a 3rd buffer on the
    # streamed x input when there are enough grid steps to use it.
    x_spec_kwargs = {}
    if n_blocks >= 3:
        x_spec_kwargs["pipeline_mode"] = pl.Buffered(3)

    out_packed = pl.pallas_call(
        _qsl_kernel,
        out_shape=jax.ShapeDtypeStruct((bp, PACK * A), jnp.float32),
        grid=(n_blocks,),
        in_specs=[
            pl.BlockSpec((tbp, PACK * D), lambda i: (i, 0), **x_spec_kwargs),
            pl.BlockSpec((PACK * D, PACK * A), lambda i: (0, 0)),  # resident
            pl.BlockSpec((1, PACK * A), lambda i: (0, 0)),         # resident
        ],
        out_specs=pl.BlockSpec((tbp, PACK * A), lambda i: (i, 0)),
        compiler_params=pltpu.CompilerParams(
            dimension_semantics=("parallel",),
        ),
    )(x_packed, w_block, b_block)

    # Unpack (zero-copy reshape) and drop padded rows (they hold b_fold junk).
    return out_packed.reshape(b_padded, A)[:B]


# --------------------------------------------------------------------------
# Parameter init (PyTorch-style uniform(+-1/sqrt(fan_in))), weights stored as
# (in_features, out_features) so matmuls are plain `x @ W + b`.
# --------------------------------------------------------------------------
def init_params(key, d_model, attention_dim, num_strategies):
    A, D, P = attention_dim, d_model, num_strategies

    def lin(key, fan_in, fan_out):
        k1, k2 = jax.random.split(key)
        bound = 1.0 / math.sqrt(fan_in)
        w = jax.random.uniform(k1, (fan_in, fan_out), jnp.float32, -bound, bound)
        b = jax.random.uniform(k2, (1, fan_out), jnp.float32, -bound, bound)
        return w, b

    keys = jax.random.split(key, 10)
    ws, bs = lin(keys[0], D, P)        # stacked strategy heads Linear(D -> 1) x P
    wq, bq = lin(keys[1], D, A)        # attention_q (dead branch, kept for ref)
    wk, bk = lin(keys[2], P, A)        # attention_k (dead branch, kept for ref)
    wv, bv = lin(keys[3], P, A)        # attention_v
    wiq, biq = lin(keys[4], A, A)      # MHA in_proj (q rows)   (dead branch)
    wik, bik = lin(keys[5], A, A)      # MHA in_proj (k rows)   (dead branch)
    wiv, biv = lin(keys[6], A, A)      # MHA in_proj (v rows)
    wo, bo = lin(keys[7], A, A)        # MHA out_proj
    wfc, bfc = lin(keys[8], A, A)      # output_fc

    return dict(ws=ws, bs=bs, wq=wq, bq=bq, wk=wk, bk=bk, wv=wv, bv=bv,
                wiq=wiq, biq=biq, wik=wik, bik=bik, wiv=wiv, biv=biv,
                wo=wo, bo=bo, wfc=wfc, bfc=bfc)


# --------------------------------------------------------------------------
# Pure-JAX reference of the full (unfused) forward pass, including the dead
# q/k branch and the length-1 softmax, for verification.
# --------------------------------------------------------------------------
def reference(market_data, params):
    A = params["wq"].shape[1]
    x_last = market_data[:, -1, :]
    strat = x_last @ params["ws"] + params["bs"]
    q = x_last @ params["wq"] + params["bq"]
    k = strat @ params["wk"] + params["bk"]
    v = strat @ params["wv"] + params["bv"]
    qp = q @ params["wiq"] + params["biq"]
    kp = k @ params["wik"] + params["bik"]
    vp = v @ params["wiv"] + params["biv"]
    scores = jnp.sum(qp * kp, axis=-1, keepdims=True) / math.sqrt(A)
    probs = jax.nn.softmax(scores, axis=-1)   # length-1 key axis -> all ones
    ctx = probs * vp
    attn_out = ctx @ params["wo"] + params["bo"]
    return attn_out @ params["wfc"] + params["bfc"]


if __name__ == "__main__":
    # batch, seq, d_model, attention_dim, |strategy_pool|
    B, S, D, A, P = 2, 8, 32, 16, 4

    key = jax.random.PRNGKey(0)
    k_x, k_p, k_x2 = jax.random.split(key, 3)
    market_data = jax.random.normal(k_x, (B, S, D), jnp.float32)
    symbol_ids = jnp.arange(B, dtype=jnp.int32)   # accepted but unused
    params = init_params(k_p, D, A, P)

    # jit so the last-step slice / pad / packing reshape fuse into one copy.
    qsl = jax.jit(quantum_strategy_layer, static_argnames=("block_b",))

    # small case: single full-array block, grid=(1,)
    out = jax.block_until_ready(qsl(market_data, params, symbol_ids))
    ref = reference(market_data, params)
    assert out.shape == (B, A)
    assert jnp.allclose(out, ref, atol=1e-4, rtol=1e-4), "mismatch vs reference (small)"

    # larger case, default (large) tile: two balanced blocks + ragged-tail padding
    B2 = 1037
    market_data2 = jax.random.normal(k_x2, (B2, S, D), jnp.float32)
    out2 = jax.block_until_ready(qsl(market_data2, params))
    ref2 = reference(market_data2, params)
    assert out2.shape == (B2, A)
    assert jnp.allclose(out2, ref2, atol=1e-4, rtol=1e-4), "mismatch vs reference (tiled)"

    # deliberately small tile ONLY to exercise the multi-block + Buffered(3)
    # pipeline path at test scale (production should keep the large default).
    out3 = jax.block_until_ready(qsl(market_data2, params, block_b=256))
    assert jnp.allclose(out3, ref2, atol=1e-4, rtol=1e-4), "mismatch vs reference (deep pipeline)"

    print("KERNEL_OK")
</pallas_src>

<mosaic_0001>
module attributes {stable_mosaic.version = 11 : i64} {
  func.func @_qsl_kernel(%arg0: i32, %arg1: memref<8x256xf32, #tpu.memory_space<vmem>>, %arg2: memref<256x128xf32, #tpu.memory_space<vmem>>, %arg3: memref<1x128xf32, #tpu.memory_space<vmem>>, %arg4: memref<8x128xf32, #tpu.memory_space<vmem>>) attributes {dimension_semantics = [#tpu.dimension_semantics<parallel>], iteration_bounds = array<i64: 1>, scalar_prefetch = 0 : i64, scratch_operands = 0 : i64, tpu.core_type = #tpu.core_type<tc>, window_params = [{transform_indices = @transform_0, window_bounds = array<i64: 8, 256>}, {pipeline_mode = #tpu.pipeline_mode<synchronous>, transform_indices = @transform_1, window_bounds = array<i64: 256, 128>}, {pipeline_mode = #tpu.pipeline_mode<synchronous>, transform_indices = @transform_2, window_bounds = array<i64: 1, 128>}, {transform_indices = @transform_3, window_bounds = array<i64: 8, 128>}]} {
    %c0 = arith.constant 0 : index
    %c0_0 = arith.constant 0 : index
    %0 = vector.load %arg1[%c0, %c0_0] : memref<8x256xf32, #tpu.memory_space<vmem>>, vector<8x256xf32>
    %c0_1 = arith.constant 0 : index
    %c0_2 = arith.constant 0 : index
    %1 = vector.load %arg2[%c0_1, %c0_2] : memref<256x128xf32, #tpu.memory_space<vmem>>, vector<256x128xf32>
    %cst = arith.constant dense<0.000000e+00> : vector<8x128xf32>
    %2 = tpu.matmul %0, %1, %cst {dimension_numbers = #tpu.dot_dimension_numbers<[1], [0], [0], [1], [0, 0, 1, 1], [], []>} : vector<8x256xf32>, vector<256x128xf32>, vector<8x128xf32> -> vector<8x128xf32>
    %c0_3 = arith.constant 0 : index
    %c0_4 = arith.constant 0 : index
    %3 = vector.load %arg3[%c0_3, %c0_4] : memref<1x128xf32, #tpu.memory_space<vmem>>, vector<1x128xf32>
    %4 = vector.broadcast %3 : vector<1x128xf32> to vector<8x128xf32>
    %5 = arith.addf %2, %4 : vector<8x128xf32>
    %c0_5 = arith.constant 0 : index
    %c0_6 = arith.constant 0 : index
    %6 = vector.load %arg4[%c0_5, %c0_6] : memref<8x128xf32, #tpu.memory_space<vmem>>, vector<8x128xf32>
    tpu.vector_store %arg4[%c0_5, %c0_6], %5 {strides = array<i32>} : memref<8x128xf32, #tpu.memory_space<vmem>>, vector<8x128xf32>,
    return
  }
  func.func @transform_0(%arg0: i32) -> (i32, i32) {
    %c0_i32 = arith.constant 0 : i32
    %c0_i32_0 = arith.constant 0 : i32
    return %arg0, %c0_i32 : i32, i32
  }
  func.func @transform_1(%arg0: i32) -> (i32, i32) {
    %c0_i32 = arith.constant 0 : i32
    %c0_i32_0 = arith.constant 0 : i32
    %c0_i32_1 = arith.constant 0 : i32
    return %c0_i32, %c0_i32_0 : i32, i32
  }
  func.func @transform_2(%arg0: i32) -> (i32, i32) {
    %c0_i32 = arith.constant 0 : i32
    %c0_i32_0 = arith.constant 0 : i32
    %c0_i32_1 = arith.constant 0 : i32
    return %c0_i32, %c0_i32_0 : i32, i32
  }
  func.func @transform_3(%arg0: i32) -> (i32, i32) {
    %c0_i32 = arith.constant 0 : i32
    %c0_i32_0 = arith.constant 0 : i32
    return %arg0, %c0_i32 : i32, i32
  }
}

</mosaic_0001>

<bundles_post_ra>
// kernel: quantum_strategy_layer.1
= control target key start
LH: loop header
LB: loop body
LE: loop exit
PB: predicated region body
PF: predicated region fallthrough
CT: control target
= control target key end

     0   :  { %s326_s1 = inlined_call_operand.vmem [shape: f32[256,128], index: 1, kind: input, shape index: {}]   ;;  %s327_s0 = inlined_call_operand.vmem [shape: f32[8,256], index: 0, kind: input, shape index: {}]   ;;  %s328_s2 = inlined_call_operand.vmem [shape: f32[1,128], index: 2, kind: input, shape index: {}]   ;;  %s329_s3 = inlined_call_operand.vmem [shape: f32[8,128], index: 3, kind: output, shape index: {}]  }
   0x1   :  { %v32_v0 = vld [vmem:[%s326_s1 + $0x80] sm:$0xff]  ;;  %v33_v1 = vld [vmem:[%s326_s1 + $0x88] sm:$0xff]  ;;  %v34_v5 = vld [vmem:[%s326_s1 + $0x90] sm:$0xff] }
   0x2   :  { %v16_v2 = vld [vmem:[%s326_s1] sm:$0xff]  ;;  %v166_v3 = vpack.c.bf16 %v33_v1, %v32_v0  ;;  %v17_v4 = vld [vmem:[%s326_s1 + $0x8] sm:$0xff]  ;;  %v35_v6 = vld [vmem:[%s326_s1 + $0x98] sm:$0xff] }
   0x3   :  { %v168_v7 = vpack.c.bf16 %v17_v4, %v16_v2  ;;  %v170_v8 = vpack.c.bf16 %v35_v6, %v34_v5  ;;  %v18_v9 = vld [vmem:[%s326_s1 + $0x10] sm:$0xff]  ;;  %v19_v10 = vld [vmem:[%s326_s1 + $0x18] sm:$0xff]  ;;  %v36_v11 = vld [vmem:[%s326_s1 + $0xa0] sm:$0xff] }
   0x4   :  { %167 = vmatprep.subr.bf16.mxu0 %v166_v3  ;;  %v37_v12 = vld [vmem:[%s326_s1 + $0xa8] sm:$0xff]  ;;  %v172_v13 = vpack.c.bf16 %v19_v10, %v18_v9  ;;  %v20_v15 = vld [vmem:[%s326_s1 + $0x20] sm:$0xff]  ;;  %v38_v17 = vld [vmem:[%s326_s1 + $0xb0] sm:$0xff] }
   0x5   :  { %169 = vmatpush3.bf16.msra.mxu0 %v168_v7  ;;  %v174_v14 = vpack.c.bf16 %v37_v12, %v36_v11  ;;  %v21_v16 = vld [vmem:[%s326_s1 + $0x28] sm:$0xff]  ;;  %v39_v18 = vld [vmem:[%s326_s1 + $0xb8] sm:$0xff]  ;;  %v22_v21 = vld [vmem:[%s326_s1 + $0x30] sm:$0xff] }
   0x6   :  { %171 = vmatprep.subr.bf16.mxu0 %v170_v8  ;;  %v176_v19 = vpack.c.bf16 %v21_v16, %v20_v15  ;;  %v178_v20 = vpack.c.bf16 %v39_v18, %v38_v17  ;;  %v23_v22 = vld [vmem:[%s326_s1 + $0x38] sm:$0xff]  ;;  %v40_v23 = vld [vmem:[%s326_s1 + $0xc0] sm:$0xff]  ;;  %v41_v24 = vld [vmem:[%s326_s1 + $0xc8] sm:$0xff] }
   0x7   :  { %v15_v25 = vld [vmem:[%s327_s0 + $0x8] sm:$0xff]  ;;  %v180_v26 = vpack.c.bf16 %v23_v22, %v22_v21  ;;  %v182_v27 = vpack.c.bf16 %v41_v24, %v40_v23  ;;  %v24_v28 = vld [vmem:[%s326_s1 + $0x40] sm:$0xff]  ;;  %v42_v30 = vld [vmem:[%s326_s1 + $0xd0] sm:$0xff] }
   0x8   :  { %119 = vmatprep.mubr.f32.mxu0 %v15_v25  ;;  %v25_v29 = vld [vmem:[%s326_s1 + $0x48] sm:$0xff]  ;;  %v43_v31 = vld [vmem:[%s326_s1 + $0xd8] sm:$0xff]  ;;  %v26_v34 = vld [vmem:[%s326_s1 + $0x50] sm:$0xff] }
   0x9   :  { %173 = vmatpush3.bf16.msra.mxu0 %v172_v13  ;;  %v184_v32 = vpack.c.bf16 %v25_v29, %v24_v28  ;;  %v186_v33 = vpack.c.bf16 %v43_v31, %v42_v30  ;;  %v27_v35 = vld [vmem:[%s326_s1 + $0x58] sm:$0xff]  ;;  %v44_v36 = vld [vmem:[%s326_s1 + $0xe0] sm:$0xff]  ;;  %v45_v37 = vld [vmem:[%s326_s1 + $0xe8] sm:$0xff] }
   0xa   :  { %175 = vmatprep.subr.bf16.mxu0 %v174_v14  ;;  %v188_v38 = vpack.c.bf16 %v27_v35, %v26_v34  ;;  %v190_v39 = vpack.c.bf16 %v45_v37, %v44_v36  ;;  %v28_v40 = vld [vmem:[%s326_s1 + $0x60] sm:$0xff]  ;;  %v29_v41 = vld [vmem:[%s326_s1 + $0x68] sm:$0xff]  ;;  %v46_v42 = vld [vmem:[%s326_s1 + $0xf0] sm:$0xff] }
   0xb   :  { %v47_v43 = vld [vmem:[%s326_s1 + $0xf8] sm:$0xff]  ;;  %v192_v44 = vpack.c.bf16 %v29_v41, %v28_v40  ;;  %v30_v46 = vld [vmem:[%s326_s1 + $0x70] sm:$0xff]  ;;  %v14_v49 = vld [vmem:[%s327_s0] sm:$0xff] }
   0xc   :  { %v194_v45 = vpack.c.bf16 %v47_v43, %v46_v42  ;;  %v31_v47 = vld [vmem:[%s326_s1 + $0x78] sm:$0xff]  ;;  %v130_v51 = vld [vmem:[%s328_s2] ss:$0 sm:$0xff] }
   0xd   :  { %177 = vmatpush3.bf16.msra.mxu0 %v176_v19  ;;  %v196_v48 = vpack.c.bf16 %v31_v47, %v30_v46 }
   0xe   :  { %179 = vmatprep.subr.bf16.mxu0 %v178_v20 }
  0x11   :  { %181 = vmatpush3.bf16.msra.mxu0 %v180_v26 }
  0x12   :  { %183 = vmatprep.subr.bf16.mxu0 %v182_v27 }
  0x15   :  { %185 = vmatpush3.bf16.msra.mxu0 %v184_v32 }
  0x16   :  { %187 = vmatprep.subr.bf16.mxu0 %v186_v33 }
  0x19   :  { %189 = vmatpush3.bf16.msra.mxu0 %v188_v38 }
  0x1a   :  { %191 = vmatprep.subr.bf16.mxu0 %v190_v39 }
  0x1d   :  { %193 = vmatpush3.bf16.msra.mxu0 %v192_v44 }
  0x1e   :  { %195 = vmatprep.subr.bf16.mxu0 %v194_v45 }
  0x21   :  { %197 = vmatpush3.bf16.msra.mxu0 %v196_v48 }
  0x24   :  { %120 = vmatmul.mubr.f32.vlgmr.msra.gmra.mrb[0].mxu0 %v14_v49 }
  0xf7   :  { %v163_v50 = vpop.f32.mrb[0].mxu0 }
  0xf8   :  { %v164_v52 = vpop.f32.mrb[1].mxu0 }
  0xf9   :  { %v165_v53 = vadd.f32 %v164_v52, %v163_v50 }
  0xfb   :  { %v122_v54 = vadd.f32 %v165_v53, %v130_v51 }
  0xfd   :  { %125 = vst [vmem:[%s329_s3] sm:$0xff] %v122_v54 }

</bundles_post_ra>
